<compile_context>
chip_gen: v7x
topology: tpu7x:2x2x1
jax: 0.10.0
libtpu: 0.0.40
codegen_flags: <defaults>
</compile_context>

<pallas_src>
import functools

import jax
import jax.numpy as jnp
from jax import lax
from jax.experimental import pallas as pl
from jax.experimental.pallas import tpu as pltpu


def _choose_channel_tile(out_dim, hw, itemsize=4, budget_bytes=2 * 1024 * 1024):
    """Largest channel tile that divides out_dim, stays a multiple of 8 (or is
    the full dim) and keeps one (dc, hw) block under `budget_bytes`, so the
    double-buffered output fits comfortably even in v7x's 64 MiB VMEM."""
    dc = out_dim
    while dc % 16 == 0 and dc * hw * itemsize > budget_bytes:
        dc //= 2
    return dc


def _axial_pos_emb_kernel(table_ref, hi_ref, wi_ref, o_ref, *, H):
    """One channel tile of the flattened (lane-dense) positional embedding.

    table_ref: (dc, H+W) f32.  Row r holds the H-axis embedding row in its
               first H columns and the W-axis embedding row in its last W
               columns (zero-padded halves for the concat variant).
    hi_ref:    (1, hw) int32, hi_ref[0, j] = j // W  (row index of position j)
    wi_ref:    (1, hw) int32, wi_ref[0, j] = j %  W  (col index of position j)
    o_ref:     (dc, hw) output tile, hw = h*w (lane-dense, unmasked stores).
    """
    n_rows = table_ref.shape[1]            # H + W
    hw = o_ref.shape[1]

    # One-hot selection matrix S[(H+W), hw]: row k contributes to flattened
    # position j iff k == hi(j) (first H rows) or k - H == wi(j) (last W rows).
    # Built from cheap iota/compares; no in-kernel reshape/relayout needed.
    row = lax.broadcasted_iota(jnp.int32, (n_rows, hw), 0)
    is_h = row < H
    sel = (is_h & (hi_ref[...] == row)) | ((~is_h) & (wi_ref[...] == row - H))
    s = jnp.where(sel, jnp.float32(1.0), jnp.float32(0.0))

    # pos[d, j] = table[d, hi(j)] + table[d, H + wi(j)] — one MXU pass that
    # produces the tile directly in flattened lane-dense form (also makes the
    # h*w < H*W truncation free: columns beyond h*w are simply never built).
    pos = jnp.dot(table_ref[...], s, preferred_element_type=jnp.float32)
    o_ref[...] = pos.astype(o_ref.dtype)


class AxialPositionalEmbeddingImage:
    """JAX/Pallas port of the PyTorch AxialPositionalEmbeddingImage module."""

    def __init__(self, dim, axial_shape, axial_dims=None, *, key):
        assert len(axial_shape) == 2, "Axial shape for image must have 2 dimensions"
        self.dim = dim
        self.axial_shape = tuple(axial_shape)
        self.summed = axial_dims is None
        axial_dims = (dim, dim) if self.summed else tuple(axial_dims)
        assert self.summed or sum(axial_dims) == dim
        self.axial_dims = axial_dims
        H, W = self.axial_shape
        k0, k1 = jax.random.split(key)
        # Same parameter shapes as the PyTorch module: (1, H, 1, d0), (1, 1, W, d1).
        self.w0 = jax.random.normal(k0, (1, H, 1, axial_dims[0]), jnp.float32)
        self.w1 = jax.random.normal(k1, (1, 1, W, axial_dims[1]), jnp.float32)

    def __call__(self, img):
        b, c, h, w = img.shape
        H, W = self.axial_shape
        hw = h * w
        assert hw <= H * W, "sequence length exceeds maximum"
        d0, d1 = self.axial_dims
        out_dim = d0 if self.summed else d0 + d1

        # --- wrapper glue: parameter/index plumbing only, no per-element compute ---
        w0t = jnp.transpose(self.w0.reshape(H, d0))   # (d0, H) feature-major
        w1t = jnp.transpose(self.w1.reshape(W, d1))   # (d1, W) feature-major
        if self.summed:
            table = jnp.concatenate([w0t, w1t], axis=1)                   # (dim, H+W)
        else:
            table = jnp.concatenate(
                [jnp.concatenate([w0t, jnp.zeros((d0, W), jnp.float32)], axis=1),
                 jnp.concatenate([jnp.zeros((d1, H), jnp.float32), w1t], axis=1)],
                axis=0)                                                   # (dim, H+W)

        j = jnp.arange(hw, dtype=jnp.int32)
        hi_of_col = (j // W).reshape(1, hw)   # grid-row index of each flattened pos
        wi_of_col = (j % W).reshape(1, hw)    # grid-col index of each flattened pos

        dc = _choose_channel_tile(out_dim, hw)
        grid = (out_dim // dc,)

        kernel = functools.partial(_axial_pos_emb_kernel, H=H)
        pos = pl.pallas_call(
            kernel,
            out_shape=jax.ShapeDtypeStruct((out_dim, hw), img.dtype),
            grid=grid,
            in_specs=[
                pl.BlockSpec((dc, H + W), lambda i: (i, 0)),
                pl.BlockSpec((1, hw), lambda i: (0, 0)),
                pl.BlockSpec((1, hw), lambda i: (0, 0)),
            ],
            out_specs=pl.BlockSpec((dc, hw), lambda i: (i, 0)),
            compiler_params=pltpu.CompilerParams(
                dimension_semantics=("parallel",),
                vmem_limit_bytes=32 * 1024 * 1024,
            ),
        )(table, hi_of_col, wi_of_col)

        # Batch-invariant result: single XLA fan-out copy + free contiguous reshape.
        return jnp.broadcast_to(pos.reshape(out_dim, h, w)[None], (b, out_dim, h, w))


def _ref_forward(img, w0, w1, axial_shape, summed):
    """Pure-JAX reference mirroring the PyTorch forward."""
    b, c, h, w = img.shape
    H, W = axial_shape
    e0 = jnp.broadcast_to(w0, (b, H, W, w0.shape[-1])).reshape(b, H * W, -1)
    e1 = jnp.broadcast_to(w1, (b, H, W, w1.shape[-1])).reshape(b, H * W, -1)
    pos = e0 + e1 if summed else jnp.concatenate([e0, e1], axis=-1)
    pos = pos[:, : h * w].astype(img.dtype)
    return jnp.transpose(pos.reshape(b, h, w, -1), (0, 3, 1, 2))  # b d h w


if __name__ == "__main__":
    key = jax.random.PRNGKey(0)
    k_img, k_mod, k_mod2 = jax.random.split(key, 3)

    # Summed variant: img (b=2, c=4, h=16, w=16), dim=32 over axial_shape (16, 16).
    img = jax.random.normal(k_img, (2, 4, 16, 16), jnp.float32)
    mod = AxialPositionalEmbeddingImage(dim=32, axial_shape=(16, 16), key=k_mod)
    out = jax.block_until_ready(mod(img))
    ref = _ref_forward(img, mod.w0, mod.w1, mod.axial_shape, mod.summed)
    assert out.shape == (2, 32, 16, 16), out.shape
    assert out.dtype == img.dtype
    assert jnp.allclose(out, ref, atol=1e-5, rtol=1e-5), "summed mismatch vs reference"

    # Concat variant (explicit axial_dims) on a truncated grid (h*w < H*W).
    img2 = jax.random.normal(k_img, (2, 4, 8, 16), jnp.float32)
    mod2 = AxialPositionalEmbeddingImage(dim=32, axial_shape=(16, 16),
                                         axial_dims=(16, 16), key=k_mod2)
    out2 = jax.block_until_ready(mod2(img2))
    ref2 = _ref_forward(img2, mod2.w0, mod2.w1, mod2.axial_shape, mod2.summed)
    assert out2.shape == (2, 32, 8, 16), out2.shape
    assert out2.dtype == img2.dtype
    assert jnp.allclose(out2, ref2, atol=1e-5, rtol=1e-5), "concat mismatch vs reference"

    print("KERNEL_OK")
</pallas_src>

<mosaic_0001>
module attributes {stable_mosaic.version = 11 : i64} {
  func.func @_axial_pos_emb_kernel(%arg0: i32, %arg1: memref<32x32xf32, #tpu.memory_space<vmem>>, %arg2: memref<1x256xi32, #tpu.memory_space<vmem>>, %arg3: memref<1x256xi32, #tpu.memory_space<vmem>>, %arg4: memref<32x256xf32, #tpu.memory_space<vmem>>) attributes {dimension_semantics = [#tpu.dimension_semantics<parallel>], iteration_bounds = array<i64: 1>, scalar_prefetch = 0 : i64, scratch_operands = 0 : i64, tpu.core_type = #tpu.core_type<tc>, window_params = [{transform_indices = @transform_0, window_bounds = array<i64: 32, 32>}, {pipeline_mode = #tpu.pipeline_mode<synchronous>, transform_indices = @transform_1, window_bounds = array<i64: 1, 256>}, {pipeline_mode = #tpu.pipeline_mode<synchronous>, transform_indices = @transform_2, window_bounds = array<i64: 1, 256>}, {transform_indices = @transform_3, window_bounds = array<i64: 32, 256>}]} {
    %0 = tpu.iota {dimensions = array<i32: 0>} : vector<32x256xi32>
    %c16_i32 = arith.constant 16 : i32
    %1 = vector.broadcast %c16_i32 : i32 to vector<32x256xi32>
    %2 = arith.cmpi slt, %0, %1 : vector<32x256xi32>
    %c0 = arith.constant 0 : index
    %c0_0 = arith.constant 0 : index
    %3 = vector.load %arg2[%c0, %c0_0] : memref<1x256xi32, #tpu.memory_space<vmem>>, vector<1x256xi32>
    %4 = vector.broadcast %3 : vector<1x256xi32> to vector<32x256xi32>
    %5 = arith.cmpi eq, %4, %0 : vector<32x256xi32>
    %6 = arith.andi %2, %5 : vector<32x256xi1>
    %cst = arith.constant dense<true> : vector<32x256xi1>
    %7 = arith.xori %2, %cst : vector<32x256xi1>
    %c0_1 = arith.constant 0 : index
    %c0_2 = arith.constant 0 : index
    %8 = vector.load %arg3[%c0_1, %c0_2] : memref<1x256xi32, #tpu.memory_space<vmem>>, vector<1x256xi32>
    %c16_i32_3 = arith.constant 16 : i32
    %9 = vector.broadcast %c16_i32_3 : i32 to vector<32x256xi32>
    %10 = arith.subi %0, %9 : vector<32x256xi32>
    %11 = vector.broadcast %8 : vector<1x256xi32> to vector<32x256xi32>
    %12 = arith.cmpi eq, %11, %10 : vector<32x256xi32>
    %13 = arith.andi %7, %12 : vector<32x256xi1>
    %14 = arith.ori %6, %13 : vector<32x256xi1>
    %cst_4 = arith.constant 1.000000e+00 : f32
    %cst_5 = arith.constant 0.000000e+00 : f32
    %15 = vector.broadcast %cst_4 : f32 to vector<32x256xf32>
    %16 = vector.broadcast %cst_5 : f32 to vector<32x256xf32>
    %17 = arith.select %14, %15, %16 : vector<32x256xi1>, vector<32x256xf32>
    %c0_6 = arith.constant 0 : index
    %c0_7 = arith.constant 0 : index
    %18 = vector.load %arg1[%c0_6, %c0_7] : memref<32x32xf32, #tpu.memory_space<vmem>>, vector<32x32xf32>
    %cst_8 = arith.constant dense<0.000000e+00> : vector<32x256xf32>
    %19 = tpu.matmul %18, %17, %cst_8 {dimension_numbers = #tpu.dot_dimension_numbers<[1], [0], [0], [1], [0, 0, 1, 1], [], []>} : vector<32x32xf32>, vector<32x256xf32>, vector<32x256xf32> -> vector<32x256xf32>
    %c0_9 = arith.constant 0 : index
    %c0_10 = arith.constant 0 : index
    %20 = vector.load %arg4[%c0_9, %c0_10] : memref<32x256xf32, #tpu.memory_space<vmem>>, vector<32x256xf32>
    tpu.vector_store %arg4[%c0_9, %c0_10], %19 {strides = array<i32>} : memref<32x256xf32, #tpu.memory_space<vmem>>, vector<32x256xf32>,
    return
  }
  func.func @transform_0(%arg0: i32) -> (i32, i32) {
    %c0_i32 = arith.constant 0 : i32
    %c0_i32_0 = arith.constant 0 : i32
    return %arg0, %c0_i32 : i32, i32
  }
  func.func @transform_1(%arg0: i32) -> (i32, i32) {
    %c0_i32 = arith.constant 0 : i32
    %c0_i32_0 = arith.constant 0 : i32
    %c0_i32_1 = arith.constant 0 : i32
    return %c0_i32, %c0_i32_0 : i32, i32
  }
  func.func @transform_2(%arg0: i32) -> (i32, i32) {
    %c0_i32 = arith.constant 0 : i32
    %c0_i32_0 = arith.constant 0 : i32
    %c0_i32_1 = arith.constant 0 : i32
    return %c0_i32, %c0_i32_0 : i32, i32
  }
  func.func @transform_3(%arg0: i32) -> (i32, i32) {
    %c0_i32 = arith.constant 0 : i32
    %c0_i32_0 = arith.constant 0 : i32
    return %arg0, %c0_i32 : i32, i32
  }
}

</mosaic_0001>

<bundles_post_ra>
// kernel: tpu_custom_call.1
= control target key start
LH: loop header
LB: loop body
LE: loop exit
PB: predicated region body
PF: predicated region fallthrough
CT: control target
= control target key end

     0   :  { %8 = vsyncpa [#allocation3], 0  ;;  %s383_s0 = inlined_call_operand.hbm [shape: f32[32,32], index: 0, kind: input, shape index: {}]   ;;  %s384_s1 = inlined_call_operand.vmem [shape: s32[1,256], index: 1, kind: input, shape index: {}]   ;;  %s385_s2 = inlined_call_operand.vmem [shape: s32[1,256], index: 2, kind: input, shape index: {}]   ;;  %s386_s3 = inlined_call_operand.hbm [shape: f32[32,256], index: 3, kind: output, shape index: {}]  }
   0x1   :  { %9 = vsyncpa [#allocation4], 0  ;;  %s325_s12 = smov [#allocation2]   ;;  %s277_s16 = scalar_lea.hbm %s383_s0, 512 }
   0x2   :  { %s15_s13 = sshll.u32 %s325_s12, 4  ;;  %p278_p0 = scmp.ne.s32.totalorder %s383_s0, %s277_s16  ;;  %s16_s13 = int_to_ptr.vmem [resolvable:$true] %s15_s13 }
   0x3   :  { %p281_p1 = scmp.lt.u32.totalorder %s277_s16, %s383_s0 }
   0x5   :  { %p283_p2 = pnand %p281_p1, %p278_p0 }
   0x7   :  { %286 = shalt.err (!%p283_p2)
}
   0x8   :  { %s287_s21 = scalar_lea.vmem %s16_s13, 512  ;;  %p292_p4 = scmp.lt.s32.totalorder %s16_s13, %s16_s13 }
   0x9   :  { %p288_p3 = scmp.ne.s32.totalorder %s16_s13, %s287_s21  ;;  %p293_p5 = scmp.lt.s32.totalorder %s287_s21, %s287_s21 }
   0xb   :  { %p294_p6 = por %p293_p5, %p292_p4 }
   0xd   :  { %p295_p7 = pnand %p294_p6, %p288_p3 }
   0xf   :  { %298 = shalt.err (!%p295_p7)
}
  0x10   :  { %s326_s22 = smov 128   ;;  %s327_s23 = smov 8  }
  0x11   :  { %21 = dma.hbm_to_vmem [thread:$0]  %s383_s0, 512, %s16_s13, [#allocation3], %s326_s22, %s326_s22, %s327_s23  }
  0x12   :  { %321 = dma.done.wait [#allocation3], 512  }
  0x13   :  { %322 = vsyncadd [#allocation3], 4294966784  ;;  %v29_v0 = vlaneseq  ;;  %v328_v1 = vmov 0.0   ;;  %v38_v7 = vld [vmem:[%s384_s1] sm:$0x3]  ;;  %vm115_vm12 = vcmask 261120  }
  0x14   :  { %192 = vmatprep.mubr.f32.mxu0 %v328_v1  ;;  %204 = vmatprep.mubr.f32.mxu1 %v328_v1  ;;  %v67_v8 = vld [vmem:[%s385_s2] sm:$0x3]  ;;  %v329_v14 = vmov 1.0|1.0   ;;  %v113_v16 = vld [vmem:[#allocation2 + $0x10] sm:$0xff]  ;;  %v112_v17 = vld [vmem:[#allocation2 + $0x8] sm:$0xff] }
  0x15   :  { %v30_v2 = vshrl.u32 %v29_v0, 7  ;;  %v111_v15 = vld [vmem:[#allocation2] sm:$0xff]  ;;  %v114_v18 = vld [vmem:[#allocation2 + $0x18] sm:$0xff]  ;;  %s330_s0 = smov [#allocation5]  }
  0x16   :  { %s230_s1 = sshll.u32 %s330_s0, 4  ;;  %s231_s1 = int_to_ptr.vmem [resolvable:$true] %s230_s1 }
  0x17   :  { %v45_v3 = vsub.s32 1, %v30_v2  ;;  %v41_v4 = vsub.s32 0, %v30_v2  ;;  %v33_v5 = vadd.s32 24, %v30_v2  ;;  %v31_v6 = vadd.s32 8, %v30_v2  ;;  %s299_s2 = scalar_lea.vmem %s231_s1, 1024  ;;  %p304_p9 = scmp.lt.s32.totalorder %s231_s1, %s231_s1 }
  0x18   :  { %p300_p8 = scmp.ne.s32.totalorder %s231_s1, %s299_s2  ;;  %p305_p10 = scmp.lt.s32.totalorder %s299_s2, %s299_s2 }
  0x19   :  { %v244_v9 = vadd.s32 4294967280, %v33_v5  ;;  %v46_v10 = vrot.slane %v38_v7, %v45_v3  ;;  %v42_v11 = vrot.slane %v38_v7, %v41_v4  ;;  %v78_v12 = vrot.slane %v67_v8, %v45_v3 }
  0x1a   :  { %v74_v13 = vrot.slane %v67_v8, %v41_v4  ;;  %p306_p11 = por %p305_p10, %p304_p9 }
  0x1b   :  { %vm48_vm0 = vcmp.eq.s32.totalorder %v46_v10, %v30_v2  ;;  %vm50_vm1 = vcmp.eq.s32.totalorder %v46_v10, %v31_v6  ;;  %vm47_vm2 = vcmp.eq.s32.totalorder %v42_v11, %v30_v2  ;;  %vm49_vm3 = vcmp.eq.s32.totalorder %v42_v11, %v31_v6 }
  0x1c   :  { %vm257_vm4 = vmpackc.low %vm50_vm1, %vm48_vm0  ;;  %vm84_vm5 = vcmp.eq.s32.totalorder %v78_v12, %v30_v2  ;;  %vm86_vm6 = vcmp.eq.s32.totalorder %v78_v12, %v244_v9  ;;  %vm83_vm7 = vcmp.eq.s32.totalorder %v74_v13, %v30_v2  ;;  %vm85_vm8 = vcmp.eq.s32.totalorder %v74_v13, %v244_v9  ;;  %p307_p12 = pnand %p306_p11, %p300_p8 }
  0x1d   :  { %258 = vmatprep.subr.msk.bf16.mxu0 %vm257_vm4, %v329_v14  ;;  %265 = vmatprep.subr.msk.bf16.mxu1 %vm257_vm4, %v329_v14  ;;  %vm259_vm9 = vmpackc.low %vm49_vm3, %vm47_vm2 }
  0x1e   :  { %260 = vmatpush1.bf16.msk.msra.mxu0 %vm259_vm9, %v329_v14  ;;  %267 = vmatpush1.bf16.msk.msra.mxu1 %vm259_vm9, %v329_v14  ;;  %vm261_vm10 = vmpackc.low %vm86_vm6, %vm84_vm5 }
  0x1f   :  { %262 = vmatprep.subr.msk.bf16.mxu0 %vm261_vm10, %v329_v14  ;;  %266 = vmatprep.subr.msk.bf16.mxu1 %vm261_vm10, %v329_v14  ;;  %vm263_vm11 = vmpackc.low %vm85_vm8, %vm83_vm7 }
  0x22   :  { %264 = vmatpush1.bf16.msk.msra.mxu0 %vm263_vm11, %v329_v14  ;;  %268 = vmatpush1.bf16.msk.msra.mxu1 %vm263_vm11, %v329_v14 }
  0x25   :  { %253 = vmatmul.mubr.msk.f32.vlgmr.msra.gmra.mrb[0].mxu0 %vm115_vm12, %v111_v15  ;;  %255 = vmatmul.mubr.msk.f32.vlgmr.msra.gmra.mrb[0].mxu1 %vm115_vm12, %v113_v16 }
  0x26   :  { %198 = vmatprep.mubr.f32.mxu0 %v328_v1  ;;  %210 = vmatprep.mubr.f32.mxu1 %v328_v1 }
  0x29   :  { %254 = vmatmul.mubr.msk.f32.gmra.mrb[2].mxu0 %vm115_vm12, %v112_v17  ;;  %256 = vmatmul.mubr.msk.f32.gmra.mrb[2].mxu1 %vm115_vm12, %v114_v18 }
  0xf8   :  { %v194_v19 = vpop.f32.mrb[0].mxu0  ;;  %v206_v20 = vpop.f32.mrb[0].mxu1 }
  0xf9   :  { %217 = vst [vmem:[#allocation5] sm:$0xff] %v194_v19  ;;  %221 = vst [vmem:[#allocation5 + $0x20] sm:$0xff] %v206_v20  ;;  %v196_v21 = vpop.f32.mrb[1].mxu0  ;;  %v208_v22 = vpop.f32.mrb[1].mxu1 }
  0xfa   :  { %218 = vst [vmem:[#allocation5 + $0x8] sm:$0xff] %v196_v21  ;;  %222 = vst [vmem:[#allocation5 + $0x28] sm:$0xff] %v208_v22 }
  0xfc   :  { %v200_v23 = vpop.f32.mrb[2].mxu0  ;;  %v212_v24 = vpop.f32.mrb[2].mxu1 }
  0xfd   :  { %219 = vst [vmem:[#allocation5 + $0x10] sm:$0xff] %v200_v23  ;;  %223 = vst [vmem:[#allocation5 + $0x30] sm:$0xff] %v212_v24  ;;  %v202_v25 = vpop.f32.mrb[3].mxu0  ;;  %v214_v26 = vpop.f32.mrb[3].mxu1 }
  0xfe   :  { %220 = vst [vmem:[#allocation5 + $0x18] sm:$0xff] %v202_v25  ;;  %224 = vst [vmem:[#allocation5 + $0x38] sm:$0xff] %v214_v26 }
  0xff   :  { %310 = shalt.err (!%p307_p12)
}
 0x100   :  { %s311_s5 = scalar_lea.hbm %s386_s3, 1024 }
 0x101   :  { %p312_p13 = scmp.ne.s32.totalorder %s386_s3, %s311_s5  ;;  %p315_p0 = scmp.lt.u32.totalorder %s311_s5, %s386_s3 }
 0x103   :  { %p317_p1 = pnand %p315_p0, %p312_p13 }
 0x105   :  { %320 = shalt.err (!%p317_p1)
}
 0x106   :  { %s331_s10 = smov 256   ;;  %s332_s11 = smov 16  }
 0x107   :  { %236 = dma.vmem_to_hbm [thread:$0]  %s231_s1, 1024, %s386_s3, [#allocation4], %s331_s10, %s331_s10, %s332_s11  }
 0x108   :  { %323 = dma.done.wait [#allocation4], 1024  }
 0x109   :  { %324 = vsyncadd [#allocation4], 4294966272 }
 0x10a   :  { %240 = vsyncpa [#allocation3], 1 }
 0x10b   :  { %241 = vsyncpa [#allocation4], 1 }

</bundles_post_ra>
